<compile_context>
chip_gen: v7x
topology: tpu7x:2x2x1
jax: 0.10.0
libtpu: 0.0.40
codegen_flags: <defaults>
</compile_context>

<pallas_src>
import functools

import jax
import jax.numpy as jnp
from jax.experimental import pallas as pl
from jax.experimental.pallas import tpu as pltpu
import numpy as np

# ----------------------------- sizes (small) -------------------------------
VOCAB = 50
EMBED = 32
HIDDEN = 32
OUTPUT = 16
BATCH = 2
SEQ = 8
OUT_PAD = 128            # == 4*HIDDEN; lane-dense slab / output width


# ------------------------------ Pallas kernel ------------------------------
def poem_encoder_kernel(xp_ref, w_ref, out_ref, *, seq, batch, hidden):
    """Fused bi-LSTM(last step) + fc.

    xp_ref : (T*B, 8H)    gate pre-activations (input part + bias folded in);
                          row t*B+b = token (b, t); lanes 0:4H fwd, 4H:8H bwd.
    w_ref  : (3H+1, 128)  rows 0:H   -> W_hh_f^T            (4H == 128 lanes)
                          rows H:2H  -> fc_w[:, :H]^T  (lane-padded to 128)
                          rows 2H:3H -> fc_w[:, H:]^T
                          row  3H    -> fc_b
    out_ref: (B, 128)     only lanes 0:OUTPUT are meaningful
    """
    H = hidden
    H4 = 4 * H

    xp = xp_ref[...]                              # (T*B, 8H)
    w_hh = w_ref[0:H, :]                          # (H, 4H)  forward recurrent
    fcw_f = w_ref[H:2 * H, :]                     # (H, 128)
    fcw_b = w_ref[2 * H:3 * H, :]                 # (H, 128)
    fcb = w_ref[3 * H:3 * H + 1, :]               # (1, 128)

    h = jnp.zeros((batch, H), jnp.float32)
    c = jnp.zeros((batch, H), jnp.float32)

    # ---- forward recurrence, fully unrolled (seq is static & small) ----
    for t in range(seq):
        g_x = xp[t * batch:(t + 1) * batch, 0:H4]                       # (B, 4H)
        gates = g_x + jnp.dot(h, w_hh, preferred_element_type=jnp.float32)
        sig = jax.nn.sigmoid(gates)       # full-vreg EUP launch
        th = jnp.tanh(gates)              # full-vreg EUP launch
        i = sig[:, 0:H]
        f = sig[:, H:2 * H]
        g = th[:, 2 * H:3 * H]
        o = sig[:, 3 * H:4 * H]
        c = f * c + i * g
        h = o * jnp.tanh(c)

    # ---- backward direction: one step on x[T-1] from zero state ----
    # zero state => h0 @ W_hh_b == 0 and f * c0 == 0 are dropped.
    g_b = xp[(seq - 1) * batch:seq * batch, H4:2 * H4]                  # (B, 4H)
    sig_b = jax.nn.sigmoid(g_b)
    th_b = jnp.tanh(g_b)
    c_b = sig_b[:, 0:H] * th_b[:, 2 * H:3 * H]
    h_b = sig_b[:, 3 * H:4 * H] * jnp.tanh(c_b)

    # ---- final linear: concat(h_fwd, h_bwd) @ W_fc^T + b_fc (split form),
    #      written lane-dense into a 128-wide padded output.
    out = (jnp.dot(h, fcw_f, preferred_element_type=jnp.float32)
           + jnp.dot(h_b, fcw_b, preferred_element_type=jnp.float32)
           + fcb)
    out_ref[...] = out.astype(out_ref.dtype)


# ------------------------------ wrapper -------------------------------------
def poem_encoder_forward(token_ids, packed):
    """token_ids: (B, T) int32. Returns (B, OUTPUT) float32."""
    B, T = token_ids.shape
    # Glue: one gather on the fused embedding->gate-preactivation table, then
    # time-major flatten to (T*B, 8H).
    xp = jnp.take(packed["xproj_table"], token_ids, axis=0)            # (B, T, 8H)
    xp2d = jnp.transpose(xp, (1, 0, 2)).reshape(T * B, 8 * HIDDEN)
    xp2d = xp2d.astype(jnp.float32)

    vmem = pl.BlockSpec(memory_space=pltpu.MemorySpace.VMEM)
    kernel = functools.partial(poem_encoder_kernel, seq=T, batch=B, hidden=HIDDEN)
    out_pad = pl.pallas_call(
        kernel,
        out_shape=jax.ShapeDtypeStruct((B, OUT_PAD), jnp.float32),
        in_specs=[vmem, vmem],
        out_specs=vmem,
    )(xp2d, packed["w_slab"])
    return out_pad[:, :OUTPUT]


# --------------------------- parameter construction -------------------------
def init_raw_params(key):
    """PyTorch-layout parameters."""
    ks = jax.random.split(key, 12)
    bound = 1.0 / np.sqrt(HIDDEN)
    u = lambda k, shape: jax.random.uniform(
        k, shape, jnp.float32, minval=-bound, maxval=bound)
    return {
        "embedding": jax.random.normal(ks[0], (VOCAB, EMBED), jnp.float32),
        "wih_f": u(ks[1], (4 * HIDDEN, EMBED)),
        "whh_f": u(ks[2], (4 * HIDDEN, HIDDEN)),
        "b_ih_f": u(ks[3], (4 * HIDDEN,)),
        "b_hh_f": u(ks[4], (4 * HIDDEN,)),
        "wih_b": u(ks[5], (4 * HIDDEN, EMBED)),
        "whh_b": u(ks[6], (4 * HIDDEN, HIDDEN)),
        "b_ih_b": u(ks[7], (4 * HIDDEN,)),
        "b_hh_b": u(ks[8], (4 * HIDDEN,)),
        "fc_w": u(ks[9], (OUTPUT, 2 * HIDDEN)),
        "fc_b": u(ks[10], (OUTPUT,)),
    }


def pack_params(raw):
    """Fuse embedding + input projection + biases into one table; coalesce the
    remaining weights into one (3H+1, 128) slab."""
    H = HIDDEN

    # Fused per-token gate pre-activation table: (VOCAB, 8H)
    w_in = jnp.concatenate([raw["wih_f"].T, raw["wih_b"].T], axis=1)     # (E, 8H)
    bias = jnp.concatenate([raw["b_ih_f"] + raw["b_hh_f"],
                            raw["b_ih_b"] + raw["b_hh_b"]])              # (8H,)
    xproj_table = (raw["embedding"].astype(jnp.float32) @ w_in + bias)   # (VOCAB, 8H)

    # Weight slab: (3H + 1, 128)  [W_hh_f^T | fc_w_f^T | fc_w_b^T | fc_b]
    w_slab = jnp.zeros((3 * H + 1, OUT_PAD), jnp.float32)
    w_slab = w_slab.at[0:H, :].set(raw["whh_f"].T)                       # 4H == 128
    w_slab = w_slab.at[H:2 * H, 0:OUTPUT].set(raw["fc_w"][:, :H].T)
    w_slab = w_slab.at[2 * H:3 * H, 0:OUTPUT].set(raw["fc_w"][:, H:].T)
    w_slab = w_slab.at[3 * H, 0:OUTPUT].set(raw["fc_b"])

    return {"xproj_table": xproj_table, "w_slab": w_slab}


# ------------------------------ pure-JAX reference ---------------------------
def reference_forward(token_ids, raw):
    emb = jnp.take(raw["embedding"], token_ids, axis=0)  # (B, T, E)
    B, T, _ = emb.shape

    def step(x_t, h, c, wih, whh, b):
        gates = x_t @ wih.T + h @ whh.T + b
        i = jax.nn.sigmoid(gates[:, 0 * HIDDEN:1 * HIDDEN])
        f = jax.nn.sigmoid(gates[:, 1 * HIDDEN:2 * HIDDEN])
        g = jnp.tanh(gates[:, 2 * HIDDEN:3 * HIDDEN])
        o = jax.nn.sigmoid(gates[:, 3 * HIDDEN:4 * HIDDEN])
        c = f * c + i * g
        return o * jnp.tanh(c), c

    h = c = jnp.zeros((B, HIDDEN), jnp.float32)
    bf = raw["b_ih_f"] + raw["b_hh_f"]
    for t in range(T):
        h, c = step(emb[:, t, :], h, c, raw["wih_f"], raw["whh_f"], bf)

    bb = raw["b_ih_b"] + raw["b_hh_b"]
    hb, _ = step(emb[:, T - 1, :],
                 jnp.zeros((B, HIDDEN), jnp.float32),
                 jnp.zeros((B, HIDDEN), jnp.float32),
                 raw["wih_b"], raw["whh_b"], bb)

    hcat = jnp.concatenate([h, hb], axis=1)
    return hcat @ raw["fc_w"].T + raw["fc_b"]


# ------------------------------------ main -----------------------------------
if __name__ == "__main__":
    key = jax.random.PRNGKey(0)
    k_par, k_tok = jax.random.split(key)
    raw = init_raw_params(k_par)
    packed = pack_params(raw)
    token_ids = jax.random.randint(k_tok, (BATCH, SEQ), 0, VOCAB, dtype=jnp.int32)

    out = poem_encoder_forward(token_ids, packed)
    out = jax.block_until_ready(out)

    ref = reference_forward(token_ids, raw)
    assert out.shape == (BATCH, OUTPUT)
    np.testing.assert_allclose(np.asarray(out), np.asarray(ref),
                               rtol=1e-5, atol=1e-5)
    print("KERNEL_OK")
</pallas_src>

<mosaic_0001>
module attributes {stable_mosaic.version = 11 : i64} {
  func.func @poem_encoder_kernel(%arg0: memref<16x256xf32, #tpu.memory_space<vmem>>, %arg1: memref<97x128xf32, #tpu.memory_space<vmem>>, %arg2: memref<2x128xf32, #tpu.memory_space<vmem>>) attributes {dimension_semantics = [], scalar_prefetch = 0 : i64, scratch_operands = 0 : i64, tpu.core_type = #tpu.core_type<tc>} {
    %c0 = arith.constant 0 : index
    %c0_0 = arith.constant 0 : index
    %0 = vector.load %arg0[%c0, %c0_0] : memref<16x256xf32, #tpu.memory_space<vmem>>, vector<16x256xf32>
    %c0_1 = arith.constant 0 : index
    %c0_2 = arith.constant 0 : index
    %1 = vector.load %arg1[%c0_1, %c0_2] : memref<97x128xf32, #tpu.memory_space<vmem>>, vector<32x128xf32>
    %c32 = arith.constant 32 : index
    %c0_3 = arith.constant 0 : index
    %2 = vector.load %arg1[%c32, %c0_3] : memref<97x128xf32, #tpu.memory_space<vmem>>, vector<32x128xf32>
    %c64 = arith.constant 64 : index
    %c0_4 = arith.constant 0 : index
    %3 = vector.load %arg1[%c64, %c0_4] : memref<97x128xf32, #tpu.memory_space<vmem>>, vector<32x128xf32>
    %c96 = arith.constant 96 : index
    %c0_5 = arith.constant 0 : index
    %4 = vector.load %arg1[%c96, %c0_5] : memref<97x128xf32, #tpu.memory_space<vmem>>, vector<1x128xf32>
    %cst = arith.constant 0.000000e+00 : f32
    %5 = vector.broadcast %cst : f32 to vector<2x32xf32>
    %cst_6 = arith.constant 0.000000e+00 : f32
    %6 = vector.broadcast %cst_6 : f32 to vector<2x32xf32>
    %7 = vector.extract_strided_slice %0 {offsets = [0, 0], sizes = [2, 128], strides = [1, 1]} : vector<16x256xf32> to vector<2x128xf32>
    %cst_7 = arith.constant dense<0.000000e+00> : vector<2x128xf32>
    %8 = tpu.matmul %5, %1, %cst_7 {dimension_numbers = #tpu.dot_dimension_numbers<[1], [0], [0], [1], [0, 0, 1, 1], [], []>} : vector<2x32xf32>, vector<32x128xf32>, vector<2x128xf32> -> vector<2x128xf32>
    %9 = arith.addf %7, %8 : vector<2x128xf32>
    %10 = arith.negf %9 : vector<2x128xf32>
    %11 = math.exp %10 : vector<2x128xf32>
    %cst_8 = arith.constant 1.000000e+00 : f32
    %12 = vector.broadcast %cst_8 : f32 to vector<2x128xf32>
    %13 = arith.addf %12, %11 : vector<2x128xf32>
    %14 = arith.divf %12, %13 : vector<2x128xf32>
    %15 = math.tanh %9 : vector<2x128xf32>
    %16 = vector.extract_strided_slice %14 {offsets = [0, 0], sizes = [2, 32], strides = [1, 1]} : vector<2x128xf32> to vector<2x32xf32>
    %17 = vector.extract_strided_slice %14 {offsets = [0, 32], sizes = [2, 32], strides = [1, 1]} : vector<2x128xf32> to vector<2x32xf32>
    %18 = vector.extract_strided_slice %15 {offsets = [0, 64], sizes = [2, 32], strides = [1, 1]} : vector<2x128xf32> to vector<2x32xf32>
    %19 = vector.extract_strided_slice %14 {offsets = [0, 96], sizes = [2, 32], strides = [1, 1]} : vector<2x128xf32> to vector<2x32xf32>
    %20 = arith.mulf %17, %6 : vector<2x32xf32>
    %21 = arith.mulf %16, %18 : vector<2x32xf32>
    %22 = arith.addf %20, %21 : vector<2x32xf32>
    %23 = math.tanh %22 : vector<2x32xf32>
    %24 = arith.mulf %19, %23 : vector<2x32xf32>
    %25 = vector.extract_strided_slice %0 {offsets = [2, 0], sizes = [2, 128], strides = [1, 1]} : vector<16x256xf32> to vector<2x128xf32>
    %cst_9 = arith.constant dense<0.000000e+00> : vector<2x128xf32>
    %26 = tpu.matmul %24, %1, %cst_9 {dimension_numbers = #tpu.dot_dimension_numbers<[1], [0], [0], [1], [0, 0, 1, 1], [], []>} : vector<2x32xf32>, vector<32x128xf32>, vector<2x128xf32> -> vector<2x128xf32>
    %27 = arith.addf %25, %26 : vector<2x128xf32>
    %28 = arith.negf %27 : vector<2x128xf32>
    %29 = math.exp %28 : vector<2x128xf32>
    %cst_10 = arith.constant 1.000000e+00 : f32
    %30 = vector.broadcast %cst_10 : f32 to vector<2x128xf32>
    %31 = arith.addf %30, %29 : vector<2x128xf32>
    %32 = arith.divf %30, %31 : vector<2x128xf32>
    %33 = math.tanh %27 : vector<2x128xf32>
    %34 = vector.extract_strided_slice %32 {offsets = [0, 0], sizes = [2, 32], strides = [1, 1]} : vector<2x128xf32> to vector<2x32xf32>
    %35 = vector.extract_strided_slice %32 {offsets = [0, 32], sizes = [2, 32], strides = [1, 1]} : vector<2x128xf32> to vector<2x32xf32>
    %36 = vector.extract_strided_slice %33 {offsets = [0, 64], sizes = [2, 32], strides = [1, 1]} : vector<2x128xf32> to vector<2x32xf32>
    %37 = vector.extract_strided_slice %32 {offsets = [0, 96], sizes = [2, 32], strides = [1, 1]} : vector<2x128xf32> to vector<2x32xf32>
    %38 = arith.mulf %35, %22 : vector<2x32xf32>
    %39 = arith.mulf %34, %36 : vector<2x32xf32>
    %40 = arith.addf %38, %39 : vector<2x32xf32>
    %41 = math.tanh %40 : vector<2x32xf32>
    %42 = arith.mulf %37, %41 : vector<2x32xf32>
    %43 = vector.extract_strided_slice %0 {offsets = [4, 0], sizes = [2, 128], strides = [1, 1]} : vector<16x256xf32> to vector<2x128xf32>
    %cst_11 = arith.constant dense<0.000000e+00> : vector<2x128xf32>
    %44 = tpu.matmul %42, %1, %cst_11 {dimension_numbers = #tpu.dot_dimension_numbers<[1], [0], [0], [1], [0, 0, 1, 1], [], []>} : vector<2x32xf32>, vector<32x128xf32>, vector<2x128xf32> -> vector<2x128xf32>
    %45 = arith.addf %43, %44 : vector<2x128xf32>
    %46 = arith.negf %45 : vector<2x128xf32>
    %47 = math.exp %46 : vector<2x128xf32>
    %cst_12 = arith.constant 1.000000e+00 : f32
    %48 = vector.broadcast %cst_12 : f32 to vector<2x128xf32>
    %49 = arith.addf %48, %47 : vector<2x128xf32>
    %50 = arith.divf %48, %49 : vector<2x128xf32>
    %51 = math.tanh %45 : vector<2x128xf32>
    %52 = vector.extract_strided_slice %50 {offsets = [0, 0], sizes = [2, 32], strides = [1, 1]} : vector<2x128xf32> to vector<2x32xf32>
    %53 = vector.extract_strided_slice %50 {offsets = [0, 32], sizes = [2, 32], strides = [1, 1]} : vector<2x128xf32> to vector<2x32xf32>
    %54 = vector.extract_strided_slice %51 {offsets = [0, 64], sizes = [2, 32], strides = [1, 1]} : vector<2x128xf32> to vector<2x32xf32>
    %55 = vector.extract_strided_slice %50 {offsets = [0, 96], sizes = [2, 32], strides = [1, 1]} : vector<2x128xf32> to vector<2x32xf32>
    %56 = arith.mulf %53, %40 : vector<2x32xf32>
    %57 = arith.mulf %52, %54 : vector<2x32xf32>
    %58 = arith.addf %56, %57 : vector<2x32xf32>
    %59 = math.tanh %58 : vector<2x32xf32>
    %60 = arith.mulf %55, %59 : vector<2x32xf32>
    %61 = vector.extract_strided_slice %0 {offsets = [6, 0], sizes = [2, 128], strides = [1, 1]} : vector<16x256xf32> to vector<2x128xf32>
    %cst_13 = arith.constant dense<0.000000e+00> : vector<2x128xf32>
    %62 = tpu.matmul %60, %1, %cst_13 {dimension_numbers = #tpu.dot_dimension_numbers<[1], [0], [0], [1], [0, 0, 1, 1], [], []>} : vector<2x32xf32>, vector<32x128xf32>, vector<2x128xf32> -> vector<2x128xf32>
    %63 = arith.addf %61, %62 : vector<2x128xf32>
    %64 = arith.negf %63 : vector<2x128xf32>
    %65 = math.exp %64 : vector<2x128xf32>
    %cst_14 = arith.constant 1.000000e+00 : f32
    %66 = vector.broadcast %cst_14 : f32 to vector<2x128xf32>
    %67 = arith.addf %66, %65 : vector<2x128xf32>
    %68 = arith.divf %66, %67 : vector<2x128xf32>
    %69 = math.tanh %63 : vector<2x128xf32>
    %70 = vector.extract_strided_slice %68 {offsets = [0, 0], sizes = [2, 32], strides = [1, 1]} : vector<2x128xf32> to vector<2x32xf32>
    %71 = vector.extract_strided_slice %68 {offsets = [0, 32], sizes = [2, 32], strides = [1, 1]} : vector<2x128xf32> to vector<2x32xf32>
    %72 = vector.extract_strided_slice %69 {offsets = [0, 64], sizes = [2, 32], strides = [1, 1]} : vector<2x128xf32> to vector<2x32xf32>
    %73 = vector.extract_strided_slice %68 {offsets = [0, 96], sizes = [2, 32], strides = [1, 1]} : vector<2x128xf32> to vector<2x32xf32>
    %74 = arith.mulf %71, %58 : vector<2x32xf32>
    %75 = arith.mulf %70, %72 : vector<2x32xf32>
    %76 = arith.addf %74, %75 : vector<2x32xf32>
    %77 = math.tanh %76 : vector<2x32xf32>
    %78 = arith.mulf %73, %77 : vector<2x32xf32>
    %79 = vector.extract_strided_slice %0 {offsets = [8, 0], sizes = [2, 128], strides = [1, 1]} : vector<16x256xf32> to vector<2x128xf32>
    %cst_15 = arith.constant dense<0.000000e+00> : vector<2x128xf32>
    %80 = tpu.matmul %78, %1, %cst_15 {dimension_numbers = #tpu.dot_dimension_numbers<[1], [0], [0], [1], [0, 0, 1, 1], [], []>} : vector<2x32xf32>, vector<32x128xf32>, vector<2x128xf32> -> vector<2x128xf32>
    %81 = arith.addf %79, %80 : vector<2x128xf32>
    %82 = arith.negf %81 : vector<2x128xf32>
    %83 = math.exp %82 : vector<2x128xf32>
    %cst_16 = arith.constant 1.000000e+00 : f32
    %84 = vector.broadcast %cst_16 : f32 to vector<2x128xf32>
    %85 = arith.addf %84, %83 : vector<2x128xf32>
    %86 = arith.divf %84, %85 : vector<2x128xf32>
    %87 = math.tanh %81 : vector<2x128xf32>
    %88 = vector.extract_strided_slice %86 {offsets = [0, 0], sizes = [2, 32], strides = [1, 1]} : vector<2x128xf32> to vector<2x32xf32>
    %89 = vector.extract_strided_slice %86 {offsets = [0, 32], sizes = [2, 32], strides = [1, 1]} : vector<2x128xf32> to vector<2x32xf32>
    %90 = vector.extract_strided_slice %87 {offsets = [0, 64], sizes = [2, 32], strides = [1, 1]} : vector<2x128xf32> to vector<2x32xf32>
    %91 = vector.extract_strided_slice %86 {offsets = [0, 96], sizes = [2, 32], strides = [1, 1]} : vector<2x128xf32> to vector<2x32xf32>
    %92 = arith.mulf %89, %76 : vector<2x32xf32>
    %93 = arith.mulf %88, %90 : vector<2x32xf32>
    %94 = arith.addf %92, %93 : vector<2x32xf32>
    %95 = math.tanh %94 : vector<2x32xf32>
    %96 = arith.mulf %91, %95 : vector<2x32xf32>
    %97 = vector.extract_strided_slice %0 {offsets = [10, 0], sizes = [2, 128], strides = [1, 1]} : vector<16x256xf32> to vector<2x128xf32>
    %cst_17 = arith.constant dense<0.000000e+00> : vector<2x128xf32>
    %98 = tpu.matmul %96, %1, %cst_17 {dimension_numbers = #tpu.dot_dimension_numbers<[1], [0], [0], [1], [0, 0, 1, 1], [], []>} : vector<2x32xf32>, vector<32x128xf32>, vector<2x128xf32> -> vector<2x128xf32>
    %99 = arith.addf %97, %98 : vector<2x128xf32>
    %100 = arith.negf %99 : vector<2x128xf32>
    %101 = math.exp %100 : vector<2x128xf32>
    %cst_18 = arith.constant 1.000000e+00 : f32
    %102 = vector.broadcast %cst_18 : f32 to vector<2x128xf32>
    %103 = arith.addf %102, %101 : vector<2x128xf32>
    %104 = arith.divf %102, %103 : vector<2x128xf32>
    %105 = math.tanh %99 : vector<2x128xf32>
    %106 = vector.extract_strided_slice %104 {offsets = [0, 0], sizes = [2, 32], strides = [1, 1]} : vector<2x128xf32> to vector<2x32xf32>
    %107 = vector.extract_strided_slice %104 {offsets = [0, 32], sizes = [2, 32], strides = [1, 1]} : vector<2x128xf32> to vector<2x32xf32>
    %108 = vector.extract_strided_slice %105 {offsets = [0, 64], sizes = [2, 32], strides = [1, 1]} : vector<2x128xf32> to vector<2x32xf32>
    %109 = vector.extract_strided_slice %104 {offsets = [0, 96], sizes = [2, 32], strides = [1, 1]} : vector<2x128xf32> to vector<2x32xf32>
    %110 = arith.mulf %107, %94 : vector<2x32xf32>
    %111 = arith.mulf %106, %108 : vector<2x32xf32>
    %112 = arith.addf %110, %111 : vector<2x32xf32>
    %113 = math.tanh %112 : vector<2x32xf32>
    %114 = arith.mulf %109, %113 : vector<2x32xf32>
    %115 = vector.extract_strided_slice %0 {offsets = [12, 0], sizes = [2, 128], strides = [1, 1]} : vector<16x256xf32> to vector<2x128xf32>
    %cst_19 = arith.constant dense<0.000000e+00> : vector<2x128xf32>
    %116 = tpu.matmul %114, %1, %cst_19 {dimension_numbers = #tpu.dot_dimension_numbers<[1], [0], [0], [1], [0, 0, 1, 1], [], []>} : vector<2x32xf32>, vector<32x128xf32>, vector<2x128xf32> -> vector<2x128xf32>
    %117 = arith.addf %115, %116 : vector<2x128xf32>
    %118 = arith.negf %117 : vector<2x128xf32>
    %119 = math.exp %118 : vector<2x128xf32>
    %cst_20 = arith.constant 1.000000e+00 : f32
    %120 = vector.broadcast %cst_20 : f32 to vector<2x128xf32>
    %121 = arith.addf %120, %119 : vector<2x128xf32>
    %122 = arith.divf %120, %121 : vector<2x128xf32>
    %123 = math.tanh %117 : vector<2x128xf32>
    %124 = vector.extract_strided_slice %122 {offsets = [0, 0], sizes = [2, 32], strides = [1, 1]} : vector<2x128xf32> to vector<2x32xf32>
    %125 = vector.extract_strided_slice %122 {offsets = [0, 32], sizes = [2, 32], strides = [1, 1]} : vector<2x128xf32> to vector<2x32xf32>
    %126 = vector.extract_strided_slice %123 {offsets = [0, 64], sizes = [2, 32], strides = [1, 1]} : vector<2x128xf32> to vector<2x32xf32>
    %127 = vector.extract_strided_slice %122 {offsets = [0, 96], sizes = [2, 32], strides = [1, 1]} : vector<2x128xf32> to vector<2x32xf32>
    %128 = arith.mulf %125, %112 : vector<2x32xf32>
    %129 = arith.mulf %124, %126 : vector<2x32xf32>
    %130 = arith.addf %128, %129 : vector<2x32xf32>
    %131 = math.tanh %130 : vector<2x32xf32>
    %132 = arith.mulf %127, %131 : vector<2x32xf32>
    %133 = vector.extract_strided_slice %0 {offsets = [14, 0], sizes = [2, 128], strides = [1, 1]} : vector<16x256xf32> to vector<2x128xf32>
    %cst_21 = arith.constant dense<0.000000e+00> : vector<2x128xf32>
    %134 = tpu.matmul %132, %1, %cst_21 {dimension_numbers = #tpu.dot_dimension_numbers<[1], [0], [0], [1], [0, 0, 1, 1], [], []>} : vector<2x32xf32>, vector<32x128xf32>, vector<2x128xf32> -> vector<2x128xf32>
    %135 = arith.addf %133, %134 : vector<2x128xf32>
    %136 = arith.negf %135 : vector<2x128xf32>
    %137 = math.exp %136 : vector<2x128xf32>
    %cst_22 = arith.constant 1.000000e+00 : f32
    %138 = vector.broadcast %cst_22 : f32 to vector<2x128xf32>
    %139 = arith.addf %138, %137 : vector<2x128xf32>
    %140 = arith.divf %138, %139 : vector<2x128xf32>
    %141 = math.tanh %135 : vector<2x128xf32>
    %142 = vector.extract_strided_slice %140 {offsets = [0, 0], sizes = [2, 32], strides = [1, 1]} : vector<2x128xf32> to vector<2x32xf32>
    %143 = vector.extract_strided_slice %140 {offsets = [0, 32], sizes = [2, 32], strides = [1, 1]} : vector<2x128xf32> to vector<2x32xf32>
    %144 = vector.extract_strided_slice %141 {offsets = [0, 64], sizes = [2, 32], strides = [1, 1]} : vector<2x128xf32> to vector<2x32xf32>
    %145 = vector.extract_strided_slice %140 {offsets = [0, 96], sizes = [2, 32], strides = [1, 1]} : vector<2x128xf32> to vector<2x32xf32>
    %146 = arith.mulf %143, %130 : vector<2x32xf32>
    %147 = arith.mulf %142, %144 : vector<2x32xf32>
    %148 = arith.addf %146, %147 : vector<2x32xf32>
    %149 = math.tanh %148 : vector<2x32xf32>
    %150 = arith.mulf %145, %149 : vector<2x32xf32>
    %151 = vector.extract_strided_slice %0 {offsets = [14, 128], sizes = [2, 128], strides = [1, 1]} : vector<16x256xf32> to vector<2x128xf32>
    %152 = arith.negf %151 : vector<2x128xf32>
    %153 = math.exp %152 : vector<2x128xf32>
    %cst_23 = arith.constant 1.000000e+00 : f32
    %154 = vector.broadcast %cst_23 : f32 to vector<2x128xf32>
    %155 = arith.addf %154, %153 : vector<2x128xf32>
    %156 = arith.divf %154, %155 : vector<2x128xf32>
    %157 = math.tanh %151 : vector<2x128xf32>
    %158 = vector.extract_strided_slice %156 {offsets = [0, 0], sizes = [2, 32], strides = [1, 1]} : vector<2x128xf32> to vector<2x32xf32>
    %159 = vector.extract_strided_slice %157 {offsets = [0, 64], sizes = [2, 32], strides = [1, 1]} : vector<2x128xf32> to vector<2x32xf32>
    %160 = arith.mulf %158, %159 : vector<2x32xf32>
    %161 = vector.extract_strided_slice %156 {offsets = [0, 96], sizes = [2, 32], strides = [1, 1]} : vector<2x128xf32> to vector<2x32xf32>
    %162 = math.tanh %160 : vector<2x32xf32>
    %163 = arith.mulf %161, %162 : vector<2x32xf32>
    %cst_24 = arith.constant dense<0.000000e+00> : vector<2x128xf32>
    %164 = tpu.matmul %150, %2, %cst_24 {dimension_numbers = #tpu.dot_dimension_numbers<[1], [0], [0], [1], [0, 0, 1, 1], [], []>} : vector<2x32xf32>, vector<32x128xf32>, vector<2x128xf32> -> vector<2x128xf32>
    %cst_25 = arith.constant dense<0.000000e+00> : vector<2x128xf32>
    %165 = tpu.matmul %163, %3, %cst_25 {dimension_numbers = #tpu.dot_dimension_numbers<[1], [0], [0], [1], [0, 0, 1, 1], [], []>} : vector<2x32xf32>, vector<32x128xf32>, vector<2x128xf32> -> vector<2x128xf32>
    %166 = arith.addf %164, %165 : vector<2x128xf32>
    %167 = vector.broadcast %4 : vector<1x128xf32> to vector<2x128xf32>
    %168 = arith.addf %166, %167 : vector<2x128xf32>
    %c0_26 = arith.constant 0 : index
    %c0_27 = arith.constant 0 : index
    %169 = vector.load %arg2[%c0_26, %c0_27] : memref<2x128xf32, #tpu.memory_space<vmem>>, vector<2x128xf32>
    tpu.vector_store %arg2[%c0_26, %c0_27], %168 {strides = array<i32>} : memref<2x128xf32, #tpu.memory_space<vmem>>, vector<2x128xf32>,
    return
  }
}

</mosaic_0001>

<bundles_post_ra>
// kernel: tpu_custom_call.1
= control target key start
LH: loop header
LB: loop body
LE: loop exit
PB: predicated region body
PF: predicated region fallthrough
CT: control target
= control target key end

     0   :  { %7 = vsyncpa [#allocation3], 0  ;;  %s1667_s0 = inlined_call_operand.hbm [shape: f32[16,256], index: 0, kind: input, shape index: {}]   ;;  %s1668_s1 = inlined_call_operand.hbm [shape: f32[97,128], index: 1, kind: input, shape index: {}]   ;;  %s1669_s2 = inlined_call_operand.hbm [shape: f32[2,128], index: 2, kind: output, shape index: {}]  }
   0x1   :  { %8 = vsyncpa [#allocation6], 0 }
   0x2   :  { %9 = vsyncpa [#allocation4], 0  ;;  %s1487_s9 = smov [#allocation2]   ;;  %s1415_s13 = scalar_lea.hbm %s1667_s0, 512 }
   0x3   :  { %s15_s10 = sshll.u32 %s1487_s9, 4  ;;  %p1416_p0 = scmp.ne.s32.totalorder %s1667_s0, %s1415_s13  ;;  %s16_s10 = int_to_ptr.vmem [resolvable:$true] %s15_s10 }
   0x4   :  { %p1419_p1 = scmp.lt.u32.totalorder %s1415_s13, %s1667_s0 }
   0x6   :  { %p1421_p2 = pnand %p1419_p1, %p1416_p0 }
   0x8   :  { %1424 = shalt.err (!%p1421_p2)
}
   0x9   :  { %s1425_s18 = scalar_lea.vmem %s16_s10, 512  ;;  %p1430_p4 = scmp.lt.s32.totalorder %s16_s10, %s16_s10 }
   0xa   :  { %p1426_p3 = scmp.ne.s32.totalorder %s16_s10, %s1425_s18  ;;  %p1431_p5 = scmp.lt.s32.totalorder %s1425_s18, %s1425_s18 }
   0xc   :  { %p1432_p6 = por %p1431_p5, %p1430_p4 }
   0xe   :  { %p1433_p7 = pnand %p1432_p6, %p1426_p3 }
  0x10   :  { %1436 = shalt.err (!%p1433_p7)
}
  0x11   :  { %s1488_s19 = smov 256   ;;  %s1489_s20 = smov 16  }
  0x12   :  { %21 = dma.hbm_to_vmem [thread:$0]  %s1667_s0, 512, %s16_s10, [#allocation3], %s1488_s19, %s1488_s19, %s1489_s20  }
  0x13   :  { %s1490_s23 = smov [#allocation5]   ;;  %s1437_s27 = scalar_lea.hbm %s1668_s1, 1664 }
  0x14   :  { %s27_s24 = sshll.u32 %s1490_s23, 4  ;;  %p1438_p8 = scmp.ne.s32.totalorder %s1668_s1, %s1437_s27  ;;  %s28_s24 = int_to_ptr.vmem [resolvable:$true] %s27_s24 }
  0x15   :  { %p1441_p9 = scmp.lt.u32.totalorder %s1437_s27, %s1668_s1 }
  0x17   :  { %p1443_p10 = pnand %p1441_p9, %p1438_p8 }
  0x19   :  { %1446 = shalt.err (!%p1443_p10)
}
  0x1a   :  { %s1447_s4 = scalar_lea.vmem %s28_s24, 1664  ;;  %p1452_p12 = scmp.lt.s32.totalorder %s28_s24, %s28_s24 }
  0x1b   :  { %p1448_p11 = scmp.ne.s32.totalorder %s28_s24, %s1447_s4  ;;  %p1453_p13 = scmp.lt.s32.totalorder %s1447_s4, %s1447_s4 }
  0x1d   :  { %p1454_p0 = por %p1453_p13, %p1452_p12 }
  0x1f   :  { %p1455_p1 = pnand %p1454_p0, %p1448_p11 }
  0x21   :  { %1458 = shalt.err (!%p1455_p1)
}
  0x22   :  { %s1491_s0 = smov 128   ;;  %s1492_s5 = smov 8  }
  0x23   :  { %33 = dma.hbm_to_vmem [thread:$0]  %s1668_s1, 1664, %s28_s24, [#allocation6], %s1491_s0, %s1491_s0, %s1492_s5  }
  0x24   :  { %1481 = dma.done.wait [#allocation3], 512  }
  0x25   :  { %1482 = vsyncadd [#allocation3], 4294966784 }
  0x26   :  { %1483 = dma.done.wait [#allocation6], 1664  }
  0x27   :  { %1484 = vsyncadd [#allocation6], 4294965632  ;;  %v1493_v0 = vmov 0.0|0.0   ;;  %vm1494_vm0 = vmmov 0   ;;  %v1495_v1 = vmov 0.0   ;;  %v43_v2 = vld [vmem:[#allocation5] sm:$0xff] }
  0x28   :  { %1270 = vmatprep.subr.bf16.mxu0 %v1493_v0  ;;  %1168 = vmatprep.mubr.msk.f32.mxu0 %vm1494_vm0, %v1495_v1  ;;  %v44_v3 = vld [vmem:[#allocation5 + $0x8] sm:$0xff]  ;;  %v45_v4 = vld [vmem:[#allocation5 + $0x10] sm:$0xff]  ;;  %v46_v6 = vld [vmem:[#allocation5 + $0x18] sm:$0xff]  ;;  %s1496_s1 = smov 64   ;;  %s1497_s8 = smov 32   ;;  %vm56_vm1 = vcmask 261120  }
  0x29   :  { %1276 = vmatprep.subr.bf16.mxu1 %v1493_v0  ;;  %1179 = vmatprep.mubr.msk.f32.mxu1 %vm1494_vm0, %v1495_v1  ;;  %v1545_v5 = vpack.c.bf16 %v44_v3, %v43_v2  ;;  %v1548_v7 = vpack.c.bf16 %v46_v6, %v45_v4  ;;  %v1564_v8 = vld [vmem:[#allocation2] sm:$0xff]  ;;  %s1498_s9 = smov 96   ;;  %s1499_s10 = smov [#allocation7]  }
  0x2a   :  { %s1081_s11 = sshll.u32 %s1499_s10, 4  ;;  %s1082_s11 = int_to_ptr.vmem [resolvable:$true] %s1081_s11 }
  0x2b   :  { %1272 = vmatpush3.bf16.msra.mxu0 %v1545_v5  ;;  %1278 = vmatpush3.bf16.msra.mxu1 %v1545_v5  ;;  %s1459_s12 = scalar_lea.vmem %s1082_s11, 32  ;;  %p1464_p3 = scmp.lt.s32.totalorder %s1082_s11, %s1082_s11 }
  0x2c   :  { %1273 = vmatprep.subr.bf16.mxu0 %v1493_v0  ;;  %1279 = vmatprep.subr.bf16.mxu1 %v1493_v0  ;;  %p1460_p2 = scmp.ne.s32.totalorder %s1082_s11, %s1459_s12  ;;  %p1465_p4 = scmp.lt.s32.totalorder %s1459_s12, %s1459_s12 }
  0x2e   :  { %p1466_p5 = por %p1465_p4, %p1464_p3 }
  0x2f   :  { %1275 = vmatpush3.bf16.msra.mxu0 %v1548_v7  ;;  %1281 = vmatpush3.bf16.msra.mxu1 %v1548_v7 }
  0x30   :  { %1282 = vmatprep.subr.bf16.mxu0 %v1493_v0  ;;  %1288 = vmatprep.subr.bf16.mxu1 %v1493_v0  ;;  %p1467_p6 = pnand %p1466_p5, %p1460_p2 }
  0x32   :  { %1169 = vmatmul.mubr.f32.vlgmr.msra.gmra.mrb[0].mxu0 %v1495_v1 }
  0x33   :  { %1284 = vmatpush3.bf16.msra.mxu0 %v1545_v5  ;;  %1190 = vmatprep.mubr.msk.f32.mxu0 %vm1494_vm0, %v1495_v1 }
  0x34   :  { %1285 = vmatprep.subr.bf16.mxu0 %v1493_v0 }
  0x37   :  { %1287 = vmatpush3.bf16.msra.mxu0 %v1548_v7 }
  0x38   :  { %1294 = vmatprep.subr.bf16.mxu0 %v1493_v0 }
 0x105   :  { %v126_v9 = vpop.f32.mrb[0].mxu0 }
 0x106   :  { %v130_v10 = vadd.f32 %v126_v9, %v1564_v8  ;;  %v1170_v11 = vpop.f32.mrb[1].mxu0 }
 0x108   :  { %1343 = vtanh.f32 %v130_v10  ;;  %v1091_v13 = vmul.f32 -1.442695, %v130_v10 }
 0x10a   :  { %1345 = vpow2.f32 %v1091_v13 }
 0x112   :  { %v1344_v12 = vpop.eup %1343 }
 0x113   :  { %140 = vrot.lane.b32.xlu0 %v1344_v12, %s1496_s1 }
 0x114   :  { %v1346_v14 = vpop.eup %1345 }
 0x115   :  { %v134_v15 = vadd.f32 1.0, %v1346_v14 }
 0x117   :  { %1347 = vrcp.f32 %v134_v15 }
 0x121   :  { %v1348_v16 = vpop.eup %1347 }
 0x122   :  { %v138_v19 = vmul.f32 0.0, %v1348_v16 }
 0x185   :  { %v141_v17 = vpop.permute.xlu0 %140 }
 0x186   :  { %v143_v18 = vmul.f32 %v1348_v16, %v141_v17 }
 0x188   :  { %145 = vrot.lane.b32.xlu0 %v143_v18, %s1497_s8 }
 0x1fa   :  { %v146_v20 = vpop.permute.xlu0 %145 }
 0x1fb   :  { %v148_v21 = vadd.f32 %v146_v20, %v138_v19 }
 0x1fd   :  { %1349 = vtanh.f32 %v148_v21  ;;  %v242_v37 = vrot.slane %v148_v21, 6 }
 0x207   :  { %v1350_v22 = vpop.eup %1349 }
 0x208   :  { %151 = vrot.lane.b32.xlu1 %v1350_v22, %s1496_s1 }
 0x27a   :  { %v152_v23 = vpop.permute.xlu1 %151 }
 0x27b   :  { %v154_v24 = vmul.f32 %v1348_v16, %v152_v23 }
 0x27d   :  { %156 = vrot.lane.b32.xlu1 %v154_v24, %s1497_s8 }
 0x2ef   :  { %v157_v25 = vpop.permute.xlu1 %156 }
 0x2f0   :  { %1180 = vmatmul.mubr.msk.f32.vlgmr.msra.gmra.mrb[0].mxu1 %vm56_vm1, %v157_v25 }
 0x2f1   :  { %1290 = vmatpush3.bf16.msra.mxu1 %v1545_v5  ;;  %1201 = vmatprep.mubr.msk.f32.mxu1 %vm1494_vm0, %v1495_v1 }
 0x2f2   :  { %1291 = vmatprep.subr.bf16.mxu1 %v1493_v0 }
 0x2f5   :  { %1293 = vmatpush3.bf16.msra.mxu1 %v1548_v7 }
 0x2f6   :  { %1300 = vmatprep.subr.bf16.mxu1 %v1493_v0 }
 0x3c3   :  { %v226_v26 = vpop.f32.mrb[0].mxu1 }
 0x3c4   :  { %v231_v27 = vrot.slane %v226_v26, 6  ;;  %v1181_v28 = vpop.f32.mrb[1].mxu1  ;;  %v1614_v26 = vld [vmem:[#allocation2 + $0x10] sm:$0xff] }
 0x3c6   :  { %v233_v29 = vadd.f32 %v231_v27, %v1564_v8 }
 0x3c8   :  { %1351 = vtanh.f32 %v233_v29  ;;  %v1093_v31 = vmul.f32 -1.442695, %v233_v29 }
 0x3ca   :  { %1353 = vpow2.f32 %v1093_v31 }
 0x3d2   :  { %v1352_v30 = vpop.eup %1351 }
 0x3d3   :  { %246 = vrot.lane.b32.xlu0 %v1352_v30, %s1496_s1 }
 0x3d4   :  { %v1354_v32 = vpop.eup %1353 }
 0x3d5   :  { %v237_v33 = vadd.f32 1.0, %v1354_v32 }
 0x3d7   :  { %1355 = vrcp.f32 %v237_v33 }
 0x3e1   :  { %v1356_v34 = vpop.eup %1355 }
 0x3e2   :  { %v244_v38 = vmul.f32 %v1356_v34, %v242_v37 }
 0x445   :  { %v247_v35 = vpop.permute.xlu0 %246 }
 0x446   :  { %v249_v36 = vmul.f32 %v1356_v34, %v247_v35 }
 0x448   :  { %251 = vrot.lane.b32.xlu1 %v249_v36, %s1497_s8 }
 0x4ba   :  { %v252_v39 = vpop.permute.xlu1 %251 }
 0x4bb   :  { %v254_v40 = vadd.f32 %v252_v39, %v244_v38 }
 0x4bd   :  { %1357 = vtanh.f32 %v254_v40  ;;  %v349_v57 = vrot.slane %v254_v40, 6 }
 0x4c7   :  { %v1358_v41 = vpop.eup %1357 }
 0x4c8   :  { %257 = vrot.lane.b32.xlu0 %v1358_v41, %s1496_s1 }
 0x53a   :  { %v258_v42 = vpop.permute.xlu0 %257 }
 0x53b   :  { %v260_v43 = vmul.f32 %v1356_v34, %v258_v42 }
 0x53d   :  { %v262_v44 = vrot.slane %v260_v43, 2 }
 0x53f   :  { %263 = vrot.lane.b32.xlu1 %v262_v44, %s1497_s8 }
 0x5b1   :  { %v264_v45 = vpop.permute.xlu1 %263 }
 0x5b2   :  { %1191 = vmatmul.mubr.msk.f32.vlgmr.msra.gmra.mrb[2].mxu0 %vm56_vm1, %v264_v45 }
 0x5b3   :  { %1296 = vmatpush3.bf16.msra.mxu0 %v1545_v5  ;;  %1212 = vmatprep.mubr.msk.f32.mxu0 %vm1494_vm0, %v1495_v1 }
 0x5b4   :  { %1297 = vmatprep.subr.bf16.mxu0 %v1493_v0 }
 0x5b7   :  { %1299 = vmatpush3.bf16.msra.mxu0 %v1548_v7 }
 0x5b8   :  { %1306 = vmatprep.subr.bf16.mxu0 %v1493_v0 }
 0x685   :  { %v333_v46 = vpop.f32.mrb[2].mxu0 }
 0x686   :  { %v338_v47 = vrot.slane %v333_v46, 4  ;;  %v1192_v48 = vpop.f32.mrb[3].mxu0 }
 0x688   :  { %v340_v49 = vadd.f32 %v338_v47, %v1564_v8 }
 0x68a   :  { %1359 = vtanh.f32 %v340_v49  ;;  %v1095_v51 = vmul.f32 -1.442695, %v340_v49 }
 0x68c   :  { %1361 = vpow2.f32 %v1095_v51 }
 0x694   :  { %v1360_v50 = vpop.eup %1359 }
 0x695   :  { %353 = vrot.lane.b32.xlu0 %v1360_v50, %s1496_s1 }
 0x696   :  { %v1362_v52 = vpop.eup %1361 }
 0x697   :  { %v344_v53 = vadd.f32 1.0, %v1362_v52 }
 0x699   :  { %1363 = vrcp.f32 %v344_v53 }
 0x6a3   :  { %v1364_v54 = vpop.eup %1363 }
 0x6a4   :  { %v351_v58 = vmul.f32 %v1364_v54, %v349_v57 }
 0x707   :  { %v354_v55 = vpop.permute.xlu0 %353 }
 0x708   :  { %v356_v56 = vmul.f32 %v1364_v54, %v354_v55 }
 0x70a   :  { %358 = vrot.lane.b32.xlu1 %v356_v56, %s1497_s8 }
 0x77c   :  { %v359_v59 = vpop.permute.xlu1 %358 }
 0x77d   :  { %v361_v60 = vadd.f32 %v359_v59, %v351_v58 }
 0x77f   :  { %1365 = vtanh.f32 %v361_v60  ;;  %v456_v18 = vrot.slane %v361_v60, 6 }
 0x789   :  { %v1366_v61 = vpop.eup %1365 }
 0x78a   :  { %364 = vrot.lane.b32.xlu0 %v1366_v61, %s1496_s1 }
 0x7fc   :  { %v365_v62 = vpop.permute.xlu0 %364 }
 0x7fd   :  { %v367_v63 = vmul.f32 %v1364_v54, %v365_v62 }
 0x7ff   :  { %v369_v2 = vrot.slane %v367_v63, 4 }
 0x801   :  { %370 = vrot.lane.b32.xlu1 %v369_v2, %s1497_s8 }
 0x873   :  { %v371_v3 = vpop.permute.xlu1 %370 }
 0x874   :  { %1202 = vmatmul.mubr.msk.f32.vlgmr.msra.gmra.mrb[2].mxu1 %vm56_vm1, %v371_v3 }
 0x875   :  { %1302 = vmatpush3.bf16.msra.mxu1 %v1545_v5  ;;  %1223 = vmatprep.mubr.msk.f32.mxu1 %vm1494_vm0, %v1495_v1 }
 0x876   :  { %1303 = vmatprep.subr.bf16.mxu1 %v1493_v0 }
 0x879   :  { %1305 = vmatpush3.bf16.msra.mxu1 %v1548_v7 }
 0x87a   :  { %1312 = vmatprep.subr.bf16.mxu1 %v1493_v0 }
 0x947   :  { %v440_v4 = vpop.f32.mrb[2].mxu1 }
 0x948   :  { %v445_v6 = vrot.slane %v440_v4, 2  ;;  %v1203_v9 = vpop.f32.mrb[3].mxu1 }
 0x94a   :  { %v447_v10 = vadd.f32 %v445_v6, %v1564_v8 }
 0x94c   :  { %1367 = vtanh.f32 %v447_v10  ;;  %v1097_v12 = vmul.f32 -1.442695, %v447_v10 }
 0x94e   :  { %1369 = vpow2.f32 %v1097_v12 }
 0x956   :  { %v1368_v11 = vpop.eup %1367 }
 0x957   :  { %460 = vrot.lane.b32.xlu0 %v1368_v11, %s1496_s1 }
 0x958   :  { %v1370_v13 = vpop.eup %1369 }
 0x959   :  { %v451_v14 = vadd.f32 1.0, %v1370_v13 }
 0x95b   :  { %1371 = vrcp.f32 %v451_v14 }
 0x965   :  { %v1372_v15 = vpop.eup %1371 }
 0x966   :  { %v458_v19 = vmul.f32 %v1372_v15, %v456_v18 }
 0x9c9   :  { %v461_v16 = vpop.permute.xlu0 %460 }
 0x9ca   :  { %v463_v17 = vmul.f32 %v1372_v15, %v461_v16 }
 0x9cc   :  { %465 = vrot.lane.b32.xlu1 %v463_v17, %s1497_s8 }
 0xa3e   :  { %v466_v20 = vpop.permute.xlu1 %465 }
 0xa3f   :  { %v468_v21 = vadd.f32 %v466_v20, %v458_v19 }
 0xa41   :  { %1373 = vtanh.f32 %v468_v21  ;;  %v560_v37 = vrot.slane %v468_v21, 6 }
 0xa4b   :  { %v1374_v8 = vpop.eup %1373 }
 0xa4c   :  { %471 = vrot.lane.b32.xlu0 %v1374_v8, %s1496_s1 }
 0xabe   :  { %v472_v22 = vpop.permute.xlu0 %471 }
 0xabf   :  { %v474_v23 = vmul.f32 %v1372_v15, %v472_v22 }
 0xac1   :  { %v476_v24 = vrot.slane %v474_v23, 6 }
 0xac3   :  { %477 = vrot.lane.b32.xlu1 %v476_v24, %s1497_s8 }
 0xb35   :  { %v478_v25 = vpop.permute.xlu1 %477 }
 0xb36   :  { %1213 = vmatmul.mubr.msk.f32.vlgmr.msra.gmra.mrb[4].mxu0 %vm56_vm1, %v478_v25 }
 0xb37   :  { %1308 = vmatpush3.bf16.msra.mxu0 %v1545_v5  ;;  %1234 = vmatprep.mubr.msk.f32.mxu0 %vm1494_vm0, %v1495_v1 }
 0xb38   :  { %1309 = vmatprep.subr.bf16.mxu0 %v1493_v0 }
 0xb3b   :  { %1311 = vmatpush3.bf16.msra.mxu0 %v1548_v7 }
 0xb3c   :  { %1318 = vmatprep.subr.bf16.mxu0 %v1493_v0 }
 0xc09   :  { %v547_v27 = vpop.f32.mrb[4].mxu0 }
 0xc0a   :  { %v551_v28 = vadd.f32 %v547_v27, %v1614_v26  ;;  %v1214_v29 = vpop.f32.mrb[5].mxu0 }
 0xc0c   :  { %1375 = vtanh.f32 %v551_v28  ;;  %v1099_v31 = vmul.f32 -1.442695, %v551_v28  ;;  %v42_v28 = vld [vmem:[#allocation2 + $0x18] sm:$0xff] }
 0xc0e   :  { %1377 = vpow2.f32 %v1099_v31 }
 0xc16   :  { %v1376_v30 = vpop.eup %1375 }
 0xc17   :  { %564 = vrot.lane.b32.xlu0 %v1376_v30, %s1496_s1 }
 0xc18   :  { %v1378_v32 = vpop.eup %1377 }
 0xc19   :  { %v555_v33 = vadd.f32 1.0, %v1378_v32  ;;  %v1106_v32 = vmul.f32 -1.442695, %v42_v28 }
 0xc1b   :  { %1379 = vrcp.f32 %v555_v33 }
 0xc25   :  { %v1380_v34 = vpop.eup %1379 }
 0xc26   :  { %v562_v38 = vmul.f32 %v1380_v34, %v560_v37 }
 0xc89   :  { %v565_v35 = vpop.permute.xlu0 %564 }
 0xc8a   :  { %v567_v36 = vmul.f32 %v1380_v34, %v565_v35 }
 0xc8c   :  { %569 = vrot.lane.b32.xlu1 %v567_v36, %s1497_s8 }
 0xcfe   :  { %v570_v39 = vpop.permute.xlu1 %569 }
 0xcff   :  { %v572_v40 = vadd.f32 %v570_v39, %v562_v38 }
 0xd01   :  { %1381 = vtanh.f32 %v572_v40 }
 0xd0b   :  { %v1382_v41 = vpop.eup %1381 }
 0xd0c   :  { %575 = vrot.lane.b32.xlu0 %v1382_v41, %s1496_s1 }
 0xd7e   :  { %v576_v42 = vpop.permute.xlu0 %575 }
 0xd7f   :  { %v578_v43 = vmul.f32 %v1380_v34, %v576_v42 }
 0xd81   :  { %580 = vrot.lane.b32.xlu1 %v578_v43, %s1497_s8 }
 0xdf3   :  { %v581_v44 = vpop.permute.xlu1 %580 }
 0xdf4   :  { %1224 = vmatmul.mubr.msk.f32.vlgmr.msra.gmra.mrb[4].mxu1 %vm56_vm1, %v581_v44 }
 0xdf5   :  { %1314 = vmatpush3.bf16.msra.mxu1 %v1545_v5  ;;  %1245 = vmatprep.mubr.msk.f32.mxu1 %vm1494_vm0, %v1495_v1 }
 0xdf6   :  { %1315 = vmatprep.subr.bf16.mxu1 %v1493_v0 }
 0xdf9   :  { %1317 = vmatpush3.bf16.msra.mxu1 %v1548_v7  ;;  %v666_v7 = vrot.slane %v572_v40, 6 }
 0xdfa   :  { %1324 = vmatprep.subr.bf16.mxu1 %v1493_v0 }
 0xec7   :  { %v650_v45 = vpop.f32.mrb[4].mxu1 }
 0xec8   :  { %v655_v46 = vrot.slane %v650_v45, 6  ;;  %v1225_v47 = vpop.f32.mrb[5].mxu1 }
 0xec9   :  { %v52_v47 = vld [vmem:[#allocation5 + $0x48] sm:$0xff] }
 0xeca   :  { %v657_v48 = vadd.f32 %v655_v46, %v1614_v26  ;;  %v51_v46 = vld [vmem:[#allocation5 + $0x40] sm:$0xff] }
 0xecc   :  { %1383 = vtanh.f32 %v657_v48  ;;  %v1101_v50 = vmul.f32 -1.442695, %v657_v48  ;;  %v47_v48 = vld [vmem:[#allocation5 + $0x20] sm:$0xff] }
 0xece   :  { %1385 = vpow2.f32 %v1101_v50  ;;  %v48_v50 = vld [vmem:[#allocation5 + $0x28] sm:$0xff] }
 0xed6   :  { %v1384_v49 = vpop.eup %1383 }
 0xed7   :  { %670 = vrot.lane.b32.xlu0 %v1384_v49, %s1496_s1  ;;  %v1319_v49 = vpack.c.bf16 %v52_v47, %v51_v46 }
 0xed8   :  { %v1386_v5 = vpop.eup %1385 }
 0xed9   :  { %v661_v51 = vadd.f32 1.0, %v1386_v5  ;;  %v53_v5 = vld [vmem:[#allocation5 + $0x50] sm:$0xff] }
 0xedb   :  { %1387 = vrcp.f32 %v661_v51  ;;  %v54_v51 = vld [vmem:[#allocation5 + $0x58] sm:$0xff] }
 0xee5   :  { %v1388_v52 = vpop.eup %1387 }
 0xee6   :  { %v668_v55 = vmul.f32 %v1388_v52, %v666_v7  ;;  %v1322_v7 = vpack.c.bf16 %v54_v51, %v53_v5 }
 0xf49   :  { %v671_v53 = vpop.permute.xlu0 %670 }
 0xf4a   :  { %v673_v54 = vmul.f32 %v1388_v52, %v671_v53  ;;  %v49_v53 = vld [vmem:[#allocation5 + $0x30] sm:$0xff] }
 0xf4c   :  { %675 = vrot.lane.b32.xlu1 %v673_v54, %s1497_s8  ;;  %v50_v54 = vld [vmem:[#allocation5 + $0x38] sm:$0xff] }
 0xfbe   :  { %v676_v56 = vpop.permute.xlu1 %675 }
 0xfbf   :  { %v678_v57 = vadd.f32 %v676_v56, %v668_v55  ;;  %v1328_v55 = vpack.c.bf16 %v50_v54, %v49_v53 }
 0xfc1   :  { %1389 = vtanh.f32 %v678_v57  ;;  %v773_v15 = vrot.slane %v678_v57, 6 }
 0xfcb   :  { %v1390_v58 = vpop.eup %1389 }
 0xfcc   :  { %681 = vrot.lane.b32.xlu0 %v1390_v58, %s1496_s1 }
0x103e   :  { %v682_v59 = vpop.permute.xlu0 %681 }
0x103f   :  { %v684_v60 = vmul.f32 %v1388_v52, %v682_v59  ;;  %v1325_v52 = vpack.c.bf16 %v48_v50, %v47_v48 }
0x1041   :  { %v686_v61 = vrot.slane %v684_v60, 2 }
0x1043   :  { %687 = vrot.lane.b32.xlu1 %v686_v61, %s1497_s8 }
0x10b5   :  { %v688_v62 = vpop.permute.xlu1 %687 }
0x10b6   :  { %1235 = vmatmul.mubr.msk.f32.vlgmr.msra.gmra.mrb[6].mxu0 %vm56_vm1, %v688_v62 }
0x10b7   :  { %1256 = vmatprep.mubr.msk.f32.mxu0 %vm1494_vm0, %v1495_v1  ;;  %1320 = vmatpush3.bf16.msra.mxu0 %v1319_v49 }
0x10b8   :  { %1321 = vmatprep.subr.bf16.mxu0 %v1493_v0 }
0x10bb   :  { %1323 = vmatpush3.bf16.msra.mxu0 %v1322_v7 }
0x1189   :  { %v757_v63 = vpop.f32.mrb[6].mxu0 }
0x118a   :  { %v762_v2 = vrot.slane %v757_v63, 4  ;;  %v1236_v3 = vpop.f32.mrb[7].mxu0 }
0x118c   :  { %v764_v4 = vadd.f32 %v762_v2, %v1614_v26 }
0x118e   :  { %1391 = vtanh.f32 %v764_v4  ;;  %v1103_v9 = vmul.f32 -1.442695, %v764_v4  ;;  %v1109_v4 = vld [vmem:[#allocation5 + $0x60] ss:$0 sm:$0xff] }
0x1190   :  { %1393 = vpow2.f32 %v1103_v9 }
0x1198   :  { %v1392_v6 = vpop.eup %1391 }
0x1199   :  { %777 = vrot.lane.b32.xlu0 %v1392_v6, %s1496_s1 }
0x119a   :  { %v1394_v10 = vpop.eup %1393 }
0x119b   :  { %v768_v11 = vadd.f32 1.0, %v1394_v10 }
0x119d   :  { %1395 = vrcp.f32 %v768_v11 }
0x11a7   :  { %v1396_v12 = vpop.eup %1395 }
0x11a8   :  { %v775_v16 = vmul.f32 %v1396_v12, %v773_v15 }
0x120b   :  { %v778_v13 = vpop.permute.xlu0 %777 }
0x120c   :  { %v780_v14 = vmul.f32 %v1396_v12, %v778_v13 }
0x120e   :  { %782 = vrot.lane.b32.xlu1 %v780_v14, %s1497_s8 }
0x1280   :  { %v783_v17 = vpop.permute.xlu1 %782 }
0x1281   :  { %v785_v18 = vadd.f32 %v783_v17, %v775_v16 }
0x1283   :  { %1397 = vtanh.f32 %v785_v18  ;;  %v880_v42 = vrot.slane %v785_v18, 6 }
0x128d   :  { %v1398_v19 = vpop.eup %1397 }
0x128e   :  { %788 = vrot.lane.b32.xlu0 %v1398_v19, %s1496_s1 }
0x1300   :  { %v789_v20 = vpop.permute.xlu0 %788 }
0x1301   :  { %v791_v21 = vmul.f32 %v1396_v12, %v789_v20 }
0x1303   :  { %v793_v8 = vrot.slane %v791_v21, 4 }
0x1305   :  { %794 = vrot.lane.b32.xlu1 %v793_v8, %s1497_s8 }
0x1377   :  { %v795_v22 = vpop.permute.xlu1 %794 }
0x1378   :  { %1246 = vmatmul.mubr.msk.f32.vlgmr.msra.gmra.mrb[6].mxu1 %vm56_vm1, %v795_v22 }
0x1379   :  { %1267 = vmatprep.mubr.msk.f32.mxu1 %vm1494_vm0, %v1495_v1  ;;  %1326 = vmatpush3.bf16.msra.mxu1 %v1325_v52 }
0x137a   :  { %1327 = vmatprep.subr.bf16.mxu1 %v1493_v0 }
0x137d   :  { %1329 = vmatpush3.bf16.msra.mxu1 %v1328_v55 }
0x144b   :  { %v864_v23 = vpop.f32.mrb[6].mxu1 }
0x144c   :  { %v869_v24 = vrot.slane %v864_v23, 2  ;;  %v1247_v25 = vpop.f32.mrb[7].mxu1 }
0x144e   :  { %v871_v27 = vadd.f32 %v869_v24, %v1614_v26 }
0x1450   :  { %1399 = vtanh.f32 %v871_v27  ;;  %v1105_v31 = vmul.f32 -1.442695, %v871_v27 }
0x1451   :  { %1401 = vtanh.f32 %v42_v28 }
0x1452   :  { %1403 = vpow2.f32 %v1105_v31 }
0x1453   :  { %1405 = vpow2.f32 %v1106_v32 }
0x145a   :  { %v1400_v29 = vpop.eup %1399 }
0x145b   :  { %884 = vrot.lane.b32.xlu0 %v1400_v29, %s1496_s1  ;;  %v1402_v30 = vpop.eup %1401 }
0x145c   :  { %v1404_v33 = vpop.eup %1403 }
0x145d   :  { %v1406_v1 = vpop.eup %1405  ;;  %v875_v34 = vadd.f32 1.0, %v1404_v33 }
0x145e   :  { %v902_v35 = vadd.f32 1.0, %v1406_v1 }
0x145f   :  { %907 = vrot.lane.b32.xlu0 %v1402_v30, %s1496_s1  ;;  %1407 = vrcp.f32 %v875_v34 }
0x1460   :  { %1409 = vrcp.f32 %v902_v35 }
0x1469   :  { %v1408_v26 = vpop.eup %1407 }
0x146a   :  { %v1410_v38 = vpop.eup %1409  ;;  %v882_v43 = vmul.f32 %v1408_v26, %v880_v42 }
0x14cd   :  { %v885_v36 = vpop.permute.xlu0 %884 }
0x14ce   :  { %v887_v37 = vmul.f32 %v1408_v26, %v885_v36 }
0x14d0   :  { %889 = vrot.lane.b32.xlu1 %v887_v37, %s1497_s8 }
0x14d1   :  { %v908_v39 = vpop.permute.xlu0 %907 }
0x14d2   :  { %v910_v40 = vmul.f32 %v1410_v38, %v908_v39 }
0x14d4   :  { %1411 = vtanh.f32 %v910_v40 }
0x14de   :  { %v1412_v41 = vpop.eup %1411 }
0x14df   :  { %913 = vrot.lane.b32.xlu0 %v1412_v41, %s1498_s9 }
0x1542   :  { %v890_v44 = vpop.permute.xlu1 %889 }
0x1543   :  { %v892_v45 = vadd.f32 %v890_v44, %v882_v43 }
0x1545   :  { %1413 = vtanh.f32 %v892_v45 }
0x154f   :  { %v1414_v56 = vpop.eup %1413 }
0x1550   :  { %895 = vrot.lane.b32.xlu1 %v1414_v56, %s1496_s1 }
0x1551   :  { %v914_v57 = vpop.permute.xlu0 %913 }
0x1552   :  { %v916_v58 = vmul.f32 %v1410_v38, %v914_v57 }
0x1554   :  { %v918_v59 = vrot.slane %v916_v58, 6 }
0x1556   :  { %919 = vrot.lane.b32.xlu1 %v918_v59, %s1497_s8 }
0x15c2   :  { %v896_v60 = vpop.permute.xlu1 %895 }
0x15c3   :  { %v898_v61 = vmul.f32 %v1408_v26, %v896_v60 }
0x15c5   :  { %v994_v62 = vrot.slane %v898_v61, 6 }
0x15c7   :  { %995 = vrot.lane.b32.xlu0 %v994_v62, %s1497_s8 }
0x15c8   :  { %v920_v63 = vpop.permute.xlu1 %919 }
0x15c9   :  { %1257 = vmatmul.mubr.msk.f32.vlgmr.msra.gmra.mrb[8].mxu0 %vm56_vm1, %v920_v63 }
0x1639   :  { %v996_v2 = vpop.permute.xlu0 %995 }
0x163a   :  { %1268 = vmatmul.mubr.msk.f32.vlgmr.msra.gmra.mrb[8].mxu1 %vm56_vm1, %v996_v2 }
0x169c   :  { %v989_v0 = vpop.f32.mrb[8].mxu0 }
0x169d   :  { %v1258_v3 = vpop.f32.mrb[9].mxu0 }
0x170d   :  { %v1065_v6 = vpop.f32.mrb[8].mxu1 }
0x170e   :  { %v1066_v9 = vadd.f32 %v1065_v6, %v989_v0  ;;  %v1269_v10 = vpop.f32.mrb[9].mxu1 }
0x1710   :  { %v1073_v11 = vadd.f32 %v1109_v4, %v1066_v9 }
0x1712   :  { %1074 = vst [vmem:[#allocation7] sm:$0x3] %v1073_v11 }
0x1713   :  { %1470 = shalt.err (!%p1467_p6)
}
0x1714   :  { %s1471_s15 = scalar_lea.hbm %s1669_s2, 32 }
0x1715   :  { %p1472_p7 = scmp.ne.s32.totalorder %s1669_s2, %s1471_s15  ;;  %p1475_p8 = scmp.lt.u32.totalorder %s1471_s15, %s1669_s2 }
0x1717   :  { %p1477_p9 = pnand %p1475_p8, %p1472_p7 }
0x1719   :  { %1480 = shalt.err (!%p1477_p9)
}
0x171a   :  { %1084 = dma.vmem_to_hbm [thread:$0]  %s1082_s11, 32, %s1669_s2, [#allocation4]  }
0x171b   :  { %1485 = dma.done.wait [#allocation4], 32  }
0x171c   :  { %1486 = vsyncadd [#allocation4], 4294967264 }
0x171d   :  { %1088 = vsyncpa [#allocation3], 1 }
0x171e   :  { %1089 = vsyncpa [#allocation6], 1 }
0x171f   :  { %1090 = vsyncpa [#allocation4], 1 }

</bundles_post_ra>
